<compile_context>
chip_gen: v5e
topology: v5e:2x2
jax: 0.10.0
libtpu: 0.0.40
codegen_flags: <defaults>
</compile_context>

<pallas_src>
import jax
import jax.numpy as jnp
from jax.experimental import pallas as pl
from jax.experimental.pallas import tpu as pltpu

IN_PAD = 32     # padded input-feature lanes (17 real features -> 32 bf16 lanes)
HID_PAD = 128   # padded hidden lanes (32 real -> 128)


def _round_up(n, m):
    return (n + m - 1) // m * m


def _mlp_kernel(x_ref, w1_ref, b1_ref, w2_ref, b2_ref, w3_ref, b3_ref,
                wv_ref, bv_ref, o_ref):
    slope = jnp.float32(0.01)

    def leaky_relu(h):
        return jnp.where(h > 0, h, slope * h)

    # Layer 1: bf16 input straight from HBM, f32 MXU accumulation.
    h = jnp.dot(x_ref[...], w1_ref[...],
                preferred_element_type=jnp.float32) + b1_ref[...]
    h = leaky_relu(h)

    # Layers 2-3: f32 activations (VPU/EUP-safe on all generations), bf16 only
    # at the MXU inputs.
    for w_ref, b_ref in ((w2_ref, b2_ref), (w3_ref, b3_ref)):
        h = jnp.dot(h.astype(jnp.bfloat16), w_ref[...],
                    preferred_element_type=jnp.float32) + b_ref[...]
        h = leaky_relu(h)

    # Value head: a (TB,128)x(128,1) matmul would burn a full MXU pass for one
    # lane; do a VPU multiply + XLU lane reduction instead.  tanh is evaluated
    # on the narrow (TB, 1) vector (EUP work = TB rows, not TB*128), with the
    # scalar bias read from SMEM.
    v = jnp.sum(h * wv_ref[...], axis=-1, keepdims=True)      # (TB, 1) f32
    o_ref[...] = jnp.tanh(v + bv_ref[0, 0])                   # narrow store


def othello_nnet3_forward(x, padded_params, in_features, *, block_b=2048):
    """x: any shape reshapeable to (-1, in_features). Returns (B, 1) float32."""
    x = x.reshape(-1, in_features).astype(jnp.float32)
    B = x.shape[0]

    # Pad features to 32 lanes (padded columns zero) and cast to bf16: the MXU
    # operands were already bf16, so this only shrinks the HBM read.
    x = jnp.pad(x, ((0, 0), (0, IN_PAD - in_features))).astype(jnp.bfloat16)

    # Batch tile: multiple of 8 sublanes, capped by block_b; also cap so the
    # grid has >= 2 steps whenever the batch allows it (v7x has 2 TensorCores
    # and "parallel" grid axes shard across them).
    tb_full = _round_up(B, 8)
    tb = min(block_b, tb_full)
    if tb_full > 8:
        tb = min(tb, _round_up((tb_full + 1) // 2, 8))
    bp = _round_up(B, tb)
    if bp != B:
        x = jnp.pad(x, ((0, bp - B), (0, 0)))
    grid = (bp // tb,)

    p = padded_params
    vmem_weights = (p["w1"], p["b1"], p["w2"], p["b2"], p["w3"], p["b3"],
                    p["wv"])

    def const_spec(a):
        # Weights/biases: full-array block, same block index at every grid
        # step -> DMA'd once, resident in VMEM across the pipeline.
        return pl.BlockSpec(a.shape, lambda i, nd=a.ndim: (0,) * nd)

    in_specs = [pl.BlockSpec((tb, IN_PAD), lambda i: (i, 0))]
    in_specs += [const_spec(a) for a in vmem_weights]
    # Scalar value-head bias lives in SMEM and is read as a scalar.
    in_specs += [pl.BlockSpec(memory_space=pltpu.MemorySpace.SMEM)]
    out_spec = pl.BlockSpec((tb, 1), lambda i: (i, 0))

    flops = 2 * bp * (IN_PAD * HID_PAD + 2 * HID_PAD * HID_PAD + HID_PAD)
    weight_bytes = sum(int(a.size) * a.dtype.itemsize
                       for a in vmem_weights + (p["bv"],))
    bytes_accessed = (int(x.size) * x.dtype.itemsize   # bf16 input
                      + bp * 4                         # (bp, 1) f32 output
                      + weight_bytes)
    cost = pl.CostEstimate(flops=flops,
                           transcendentals=bp,         # one tanh per row
                           bytes_accessed=bytes_accessed)

    out = pl.pallas_call(
        _mlp_kernel,
        out_shape=jax.ShapeDtypeStruct((bp, 1), jnp.float32),
        grid=grid,
        in_specs=in_specs,
        out_specs=out_spec,
        compiler_params=pltpu.CompilerParams(
            dimension_semantics=("parallel",),
            vmem_limit_bytes=32 * 1024 * 1024),
        cost_estimate=cost,
    )(x, *vmem_weights, p["bv"])

    # Only batch padding to trim; the kernel already produced a narrow column.
    return out[:B]


def init_params(key, in_features, hidden_size):
    """Logical f32 params mirroring nn.Linear (weights kept pre-transposed as (in, out))."""
    def linear(key, fan_in, fan_out):
        kw, kb = jax.random.split(key)
        bound = 1.0 / jnp.sqrt(jnp.float32(fan_in))
        w = jax.random.uniform(kw, (fan_in, fan_out), jnp.float32, -bound, bound)
        b = jax.random.uniform(kb, (fan_out,), jnp.float32, -bound, bound)
        return w, b

    k1, k2, k3, k4 = jax.random.split(key, 4)
    w1, b1 = linear(k1, in_features, hidden_size)
    w2, b2 = linear(k2, hidden_size, hidden_size)
    w3, b3 = linear(k3, hidden_size, hidden_size)
    wv, bv = linear(k4, hidden_size, 1)
    return {"w1": w1, "b1": b1, "w2": w2, "b2": b2,
            "w3": w3, "b3": b3, "wv": wv, "bv": bv}


def prepare_params(params, in_features, hidden_size):
    """Zero-pad to TPU-friendly lane counts; matmul weights bf16, biases f32."""
    def pad_w(w, rows, cols):
        wp = jnp.zeros((rows, cols), jnp.float32).at[:w.shape[0], :w.shape[1]].set(w)
        return wp.astype(jnp.bfloat16)

    def pad_b(b, cols):
        return jnp.zeros((1, cols), jnp.float32).at[0, :b.shape[0]].set(b)

    w1 = pad_w(params["w1"], IN_PAD, HID_PAD)
    w2 = pad_w(params["w2"], HID_PAD, HID_PAD)
    w3 = pad_w(params["w3"], HID_PAD, HID_PAD)
    b1 = pad_b(params["b1"], HID_PAD)
    b2 = pad_b(params["b2"], HID_PAD)
    b3 = pad_b(params["b3"], HID_PAD)
    # Value head kept f32 as a (1, 128) row for the VPU mul + lane reduce.
    wv = jnp.zeros((1, HID_PAD), jnp.float32).at[0, :hidden_size].set(
        params["wv"].reshape(-1))
    # Scalar output bias -> (1, 1) f32, read from SMEM inside the kernel.
    bv = params["bv"].reshape(1, 1).astype(jnp.float32)
    return {"w1": w1, "b1": b1, "w2": w2, "b2": b2,
            "w3": w3, "b3": b3, "wv": wv, "bv": bv}


def reference_forward(x, padded_params, in_features):
    """Plain-JAX reference mirroring the kernel arithmetic (bf16 operands, f32 accum)."""
    p = padded_params
    h = jnp.pad(x.reshape(-1, in_features).astype(jnp.float32),
                ((0, 0), (0, IN_PAD - in_features)))
    h = h.astype(jnp.bfloat16).astype(jnp.float32)
    for w, b in ((p["w1"], p["b1"]), (p["w2"], p["b2"]), (p["w3"], p["b3"])):
        h = jnp.dot(h, w.astype(jnp.float32)) + b
        h = jnp.where(h > 0, h, 0.01 * h)
        h = h.astype(jnp.bfloat16).astype(jnp.float32) if w is not p["w3"] else h
    v = jnp.sum(h * p["wv"], axis=-1, keepdims=True) + p["bv"][0, 0]
    return jnp.tanh(v)


if __name__ == "__main__":
    # Module-consistent small shapes: game.n = 4 -> 4x4 board -> 17 input
    # features (board_x*board_y + 1), hidden_size = 32, batch = 8.
    board_n = 4
    in_features = board_n * board_n + 1   # 17
    hidden_size = 32

    key = jax.random.PRNGKey(0)
    kx, kp, kx2 = jax.random.split(key, 3)

    logical_params = init_params(kp, in_features, hidden_size)
    params = prepare_params(logical_params, in_features, hidden_size)

    # Small, module-consistent batch (the PyTorch forward views to (-1, n*n+1)).
    batch = 8
    x = jax.random.normal(kx, (batch, in_features), dtype=jnp.float32)
    v = jax.block_until_ready(othello_nnet3_forward(x, params, in_features))
    v_ref = reference_forward(x, params, in_features)

    assert v.shape == (batch, 1)
    assert v.dtype == jnp.float32
    assert bool(jnp.all(jnp.isfinite(v)))
    assert bool(jnp.all(jnp.abs(v) <= 1.0))                       # tanh range
    assert bool(jnp.allclose(v, v_ref, atol=1e-3, rtol=1e-3)), (
        "mismatch vs reference: " + str(jnp.max(jnp.abs(v - v_ref))))

    # Second check: non-multiple-of-8 batch -> exercises batch padding and a
    # multi-step ("parallel") grid.
    batch2 = 300
    x2 = jax.random.normal(kx2, (batch2, in_features), dtype=jnp.float32)
    v2 = jax.block_until_ready(othello_nnet3_forward(x2, params, in_features))
    v2_ref = reference_forward(x2, params, in_features)
    assert v2.shape == (batch2, 1)
    assert bool(jnp.allclose(v2, v2_ref, atol=1e-3, rtol=1e-3)), (
        "mismatch vs reference (batch2): " + str(jnp.max(jnp.abs(v2 - v2_ref))))

    print("KERNEL_OK")
</pallas_src>

<mosaic_0001>
module attributes {stable_mosaic.version = 11 : i64} {
  func.func @_mlp_kernel(%arg0: i32, %arg1: memref<8x32xbf16, #tpu.memory_space<vmem>>, %arg2: memref<32x128xbf16, #tpu.memory_space<vmem>>, %arg3: memref<1x128xf32, #tpu.memory_space<vmem>>, %arg4: memref<128x128xbf16, #tpu.memory_space<vmem>>, %arg5: memref<1x128xf32, #tpu.memory_space<vmem>>, %arg6: memref<128x128xbf16, #tpu.memory_space<vmem>>, %arg7: memref<1x128xf32, #tpu.memory_space<vmem>>, %arg8: memref<1x128xf32, #tpu.memory_space<vmem>>, %arg9: memref<1x1xf32, #tpu.memory_space<smem>>, %arg10: memref<8x1xf32, #tpu.memory_space<vmem>>) attributes {dimension_semantics = [#tpu.dimension_semantics<parallel>], iteration_bounds = array<i64: 1>, scalar_prefetch = 0 : i64, scratch_operands = 0 : i64, tpu.core_type = #tpu.core_type<tc>, window_params = [{transform_indices = @transform_0, window_bounds = array<i64: 8, 32>}, {pipeline_mode = #tpu.pipeline_mode<synchronous>, transform_indices = @transform_1, window_bounds = array<i64: 32, 128>}, {pipeline_mode = #tpu.pipeline_mode<synchronous>, transform_indices = @transform_2, window_bounds = array<i64: 1, 128>}, {pipeline_mode = #tpu.pipeline_mode<synchronous>, transform_indices = @transform_3, window_bounds = array<i64: 128, 128>}, {pipeline_mode = #tpu.pipeline_mode<synchronous>, transform_indices = @transform_4, window_bounds = array<i64: 1, 128>}, {pipeline_mode = #tpu.pipeline_mode<synchronous>, transform_indices = @transform_5, window_bounds = array<i64: 128, 128>}, {pipeline_mode = #tpu.pipeline_mode<synchronous>, transform_indices = @transform_6, window_bounds = array<i64: 1, 128>}, {pipeline_mode = #tpu.pipeline_mode<synchronous>, transform_indices = @transform_7, window_bounds = array<i64: 1, 128>}, {transform_indices = @transform_8, window_bounds = array<i64: 1, 1>}, {transform_indices = @transform_9, window_bounds = array<i64: 8, 1>}]} {
    %c0 = arith.constant 0 : index
    %c0_0 = arith.constant 0 : index
    %0 = vector.load %arg1[%c0, %c0_0] : memref<8x32xbf16, #tpu.memory_space<vmem>>, vector<8x32xbf16>
    %c0_1 = arith.constant 0 : index
    %c0_2 = arith.constant 0 : index
    %1 = vector.load %arg2[%c0_1, %c0_2] : memref<32x128xbf16, #tpu.memory_space<vmem>>, vector<32x128xbf16>
    %cst = arith.constant dense<0.000000e+00> : vector<8x128xf32>
    %2 = tpu.matmul %0, %1, %cst {dimension_numbers = #tpu.dot_dimension_numbers<[1], [0], [0], [1], [0, 0, 1, 1], [], []>} : vector<8x32xbf16>, vector<32x128xbf16>, vector<8x128xf32> -> vector<8x128xf32>
    %c0_3 = arith.constant 0 : index
    %c0_4 = arith.constant 0 : index
    %3 = vector.load %arg3[%c0_3, %c0_4] : memref<1x128xf32, #tpu.memory_space<vmem>>, vector<1x128xf32>
    %4 = vector.broadcast %3 : vector<1x128xf32> to vector<8x128xf32>
    %5 = arith.addf %2, %4 : vector<8x128xf32>
    %cst_5 = arith.constant 0.000000e+00 : f32
    %6 = vector.broadcast %cst_5 : f32 to vector<8x128xf32>
    %7 = arith.cmpf ogt, %5, %6 : vector<8x128xf32>
    %cst_6 = arith.constant 0.00999999977 : f32
    %8 = vector.broadcast %cst_6 : f32 to vector<8x128xf32>
    %9 = arith.mulf %8, %5 : vector<8x128xf32>
    %10 = arith.select %7, %5, %9 : vector<8x128xi1>, vector<8x128xf32>
    %11 = arith.truncf %10 : vector<8x128xf32> to vector<8x128xbf16>
    %c0_7 = arith.constant 0 : index
    %c0_8 = arith.constant 0 : index
    %12 = vector.load %arg4[%c0_7, %c0_8] : memref<128x128xbf16, #tpu.memory_space<vmem>>, vector<128x128xbf16>
    %cst_9 = arith.constant dense<0.000000e+00> : vector<8x128xf32>
    %13 = tpu.matmul %11, %12, %cst_9 {dimension_numbers = #tpu.dot_dimension_numbers<[1], [0], [0], [1], [0, 0, 1, 1], [], []>} : vector<8x128xbf16>, vector<128x128xbf16>, vector<8x128xf32> -> vector<8x128xf32>
    %c0_10 = arith.constant 0 : index
    %c0_11 = arith.constant 0 : index
    %14 = vector.load %arg5[%c0_10, %c0_11] : memref<1x128xf32, #tpu.memory_space<vmem>>, vector<1x128xf32>
    %15 = vector.broadcast %14 : vector<1x128xf32> to vector<8x128xf32>
    %16 = arith.addf %13, %15 : vector<8x128xf32>
    %cst_12 = arith.constant 0.000000e+00 : f32
    %17 = vector.broadcast %cst_12 : f32 to vector<8x128xf32>
    %18 = arith.cmpf ogt, %16, %17 : vector<8x128xf32>
    %cst_13 = arith.constant 0.00999999977 : f32
    %19 = vector.broadcast %cst_13 : f32 to vector<8x128xf32>
    %20 = arith.mulf %19, %16 : vector<8x128xf32>
    %21 = arith.select %18, %16, %20 : vector<8x128xi1>, vector<8x128xf32>
    %22 = arith.truncf %21 : vector<8x128xf32> to vector<8x128xbf16>
    %c0_14 = arith.constant 0 : index
    %c0_15 = arith.constant 0 : index
    %23 = vector.load %arg6[%c0_14, %c0_15] : memref<128x128xbf16, #tpu.memory_space<vmem>>, vector<128x128xbf16>
    %cst_16 = arith.constant dense<0.000000e+00> : vector<8x128xf32>
    %24 = tpu.matmul %22, %23, %cst_16 {dimension_numbers = #tpu.dot_dimension_numbers<[1], [0], [0], [1], [0, 0, 1, 1], [], []>} : vector<8x128xbf16>, vector<128x128xbf16>, vector<8x128xf32> -> vector<8x128xf32>
    %c0_17 = arith.constant 0 : index
    %c0_18 = arith.constant 0 : index
    %25 = vector.load %arg7[%c0_17, %c0_18] : memref<1x128xf32, #tpu.memory_space<vmem>>, vector<1x128xf32>
    %26 = vector.broadcast %25 : vector<1x128xf32> to vector<8x128xf32>
    %27 = arith.addf %24, %26 : vector<8x128xf32>
    %cst_19 = arith.constant 0.000000e+00 : f32
    %28 = vector.broadcast %cst_19 : f32 to vector<8x128xf32>
    %29 = arith.cmpf ogt, %27, %28 : vector<8x128xf32>
    %cst_20 = arith.constant 0.00999999977 : f32
    %30 = vector.broadcast %cst_20 : f32 to vector<8x128xf32>
    %31 = arith.mulf %30, %27 : vector<8x128xf32>
    %32 = arith.select %29, %27, %31 : vector<8x128xi1>, vector<8x128xf32>
    %c0_21 = arith.constant 0 : index
    %c0_22 = arith.constant 0 : index
    %33 = vector.load %arg8[%c0_21, %c0_22] : memref<1x128xf32, #tpu.memory_space<vmem>>, vector<1x128xf32>
    %34 = vector.broadcast %33 : vector<1x128xf32> to vector<8x128xf32>
    %35 = arith.mulf %32, %34 : vector<8x128xf32>
    %cst_23 = arith.constant dense<0.000000e+00> : vector<8xf32>
    %36 = vector.multi_reduction <add>, %35, %cst_23 [1] : vector<8x128xf32> to vector<8xf32>
    %37 = vector.shape_cast %36 : vector<8xf32> to vector<8x1xf32>
    %c0_24 = arith.constant 0 : index
    %c0_25 = arith.constant 0 : index
    %38 = memref.load %arg9[%c0_24, %c0_25] : memref<1x1xf32, #tpu.memory_space<smem>>
    %39 = vector.broadcast %38 : f32 to vector<8x1xf32>
    %40 = arith.addf %37, %39 : vector<8x1xf32>
    %41 = math.tanh %40 : vector<8x1xf32>
    %c0_26 = arith.constant 0 : index
    %c0_27 = arith.constant 0 : index
    %42 = vector.load %arg10[%c0_26, %c0_27] : memref<8x1xf32, #tpu.memory_space<vmem>>, vector<8x1xf32>
    tpu.vector_store %arg10[%c0_26, %c0_27], %41 {strides = array<i32>} : memref<8x1xf32, #tpu.memory_space<vmem>>, vector<8x1xf32>,
    return
  }
  func.func @transform_0(%arg0: i32) -> (i32, i32) {
    %c0_i32 = arith.constant 0 : i32
    %c0_i32_0 = arith.constant 0 : i32
    return %arg0, %c0_i32 : i32, i32
  }
  func.func @transform_1(%arg0: i32) -> (i32, i32) {
    %c0_i32 = arith.constant 0 : i32
    %c0_i32_0 = arith.constant 0 : i32
    %c0_i32_1 = arith.constant 0 : i32
    return %c0_i32, %c0_i32_0 : i32, i32
  }
  func.func @transform_2(%arg0: i32) -> (i32, i32) {
    %c0_i32 = arith.constant 0 : i32
    %c0_i32_0 = arith.constant 0 : i32
    %c0_i32_1 = arith.constant 0 : i32
    return %c0_i32, %c0_i32_0 : i32, i32
  }
  func.func @transform_3(%arg0: i32) -> (i32, i32) {
    %c0_i32 = arith.constant 0 : i32
    %c0_i32_0 = arith.constant 0 : i32
    %c0_i32_1 = arith.constant 0 : i32
    return %c0_i32, %c0_i32_0 : i32, i32
  }
  func.func @transform_4(%arg0: i32) -> (i32, i32) {
    %c0_i32 = arith.constant 0 : i32
    %c0_i32_0 = arith.constant 0 : i32
    %c0_i32_1 = arith.constant 0 : i32
    return %c0_i32, %c0_i32_0 : i32, i32
  }
  func.func @transform_5(%arg0: i32) -> (i32, i32) {
    %c0_i32 = arith.constant 0 : i32
    %c0_i32_0 = arith.constant 0 : i32
    %c0_i32_1 = arith.constant 0 : i32
    return %c0_i32, %c0_i32_0 : i32, i32
  }
  func.func @transform_6(%arg0: i32) -> (i32, i32) {
    %c0_i32 = arith.constant 0 : i32
    %c0_i32_0 = arith.constant 0 : i32
    %c0_i32_1 = arith.constant 0 : i32
    return %c0_i32, %c0_i32_0 : i32, i32
  }
  func.func @transform_7(%arg0: i32) -> (i32, i32) {
    %c0_i32 = arith.constant 0 : i32
    %c0_i32_0 = arith.constant 0 : i32
    %c0_i32_1 = arith.constant 0 : i32
    return %c0_i32, %c0_i32_0 : i32, i32
  }
  func.func @transform_8(%arg0: i32) -> (i32, i32) {
    %c0_i32 = arith.constant 0 : i32
    %c0_i32_0 = arith.constant 0 : i32
    %c0_i32_1 = arith.constant 0 : i32
    return %c0_i32, %c0_i32_0 : i32, i32
  }
  func.func @transform_9(%arg0: i32) -> (i32, i32) {
    %c0_i32 = arith.constant 0 : i32
    %c0_i32_0 = arith.constant 0 : i32
    return %arg0, %c0_i32 : i32, i32
  }
}

</mosaic_0001>

<bundles_post_ra>
// kernel: tpu_custom_call.1
= control target key start
LH: loop header
LB: loop body
LE: loop exit
PB: predicated region body
PF: predicated region fallthrough
CT: control target
= control target key end

     0   :  { %15 = vsyncpa [#allocation4], 0  ;;  %s617_s0 = inlined_call_operand.hbm [shape: bf16[8,32], index: 0, kind: input, shape index: {}]   ;;  %s618_s1 = inlined_call_operand.hbm [shape: bf16[32,128], index: 1, kind: input, shape index: {}]   ;;  %s619_s2 = inlined_call_operand.vmem [shape: f32[1,128], index: 2, kind: input, shape index: {}]   ;;  %s620_s3 = inlined_call_operand.hbm [shape: bf16[128,128], index: 3, kind: input, shape index: {}]   ;;  %s621_s4 = inlined_call_operand.vmem [shape: f32[1,128], index: 4, kind: input, shape index: {}]   ;;  %s622_s5 = inlined_call_operand.hbm [shape: bf16[128,128], index: 5, kind: input, shape index: {}]   ;;  %s623_s6 = inlined_call_operand.vmem [shape: f32[1,128], index: 6, kind: input, shape index: {}]   ;;  %s624_s7 = inlined_call_operand.vmem [shape: f32[1,128], index: 7, kind: input, shape index: {}]   ;;  %s625_s8 = inlined_call_operand.<no memory space> [shape: f32[1,1], index: 8, kind: input, shape index: {}]   ;;  %s626_s9 = inlined_call_operand.vmem [shape: f32[8,1], index: 9, kind: output, shape index: {}]  }
   0x1   :  { %16 = vsyncpa [#allocation6], 0  ;;  %s33_s11 = sshll.u32 %s618_s1, 4  ;;  %s34_s11 = int_to_ptr.hbm [resolvable:$true] %s33_s11 }
   0x2   :  { %17 = vsyncpa [#allocation9], 0  ;;  %s531_s12 = smov [#allocation5]   ;;  %s23_s16 = sshll.u32 %s617_s0, 4  ;;  %s24_s16 = int_to_ptr.hbm [resolvable:$true] %s23_s16 }
   0x3   :  { %s35_s13 = sshll.u32 %s531_s12, 4  ;;  %s532_s17 = smov 64   ;;  %s36_s13 = int_to_ptr.vmem [resolvable:$true] %s35_s13 }
   0x4   :  { %s533_s18 = smov 4   ;;  %s534_s19 = smov [#allocation3]  }
   0x5   :  { %41 = dma.hbm_to_vmem [thread:$0]  %s34_s11, 256, %s36_s13, [#allocation6], %s532_s17, %s532_s17, %s533_s18  }
   0x6   :  { %s25_s20 = sshll.u32 %s534_s19, 4  ;;  %s48_s23 = sshll.u32 %s620_s3, 4  ;;  %s26_s20 = int_to_ptr.vmem [resolvable:$true] %s25_s20  ;;  %s49_s23 = int_to_ptr.hbm [resolvable:$true] %s48_s23 }
   0x7   :  { %28 = dma.hbm_to_vmem [thread:$0]  %s24_s16, 64, %s26_s20, [#allocation4]  }
   0x8   :  { %s63_s25 = sshll.u32 %s622_s5, 4  ;;  %s535_s26 = smov [#allocation7]   ;;  %s64_s25 = int_to_ptr.hbm [resolvable:$true] %s63_s25 }
   0x9   :  { %s50_s27 = sshll.u32 %s535_s26, 4  ;;  %s536_s0 = smov [#allocation8]   ;;  %s51_s27 = int_to_ptr.vmem [resolvable:$true] %s50_s27 }
   0xa   :  { %56 = dma.hbm_to_vmem [thread:$0]  %s49_s23, 1024, %s51_s27, [#allocation6], %s532_s17, %s532_s17, %s533_s18  }
   0xb   :  { %s65_s28 = sshll.u32 %s536_s0, 4  ;;  %s66_s28 = int_to_ptr.vmem [resolvable:$true] %s65_s28 }
   0xc   :  { %71 = dma.hbm_to_vmem [thread:$0]  %s64_s25, 1024, %s66_s28, [#allocation9], %s532_s17, %s532_s17, %s533_s18  }
   0xd   :  { %525 = dma.done.wait [#allocation4], 64  }
   0xe   :  { %526 = vsyncadd [#allocation4], 4294967232 }
   0xf   :  { %527 = dma.done.wait [#allocation6], 1280  }
  0x10   :  { %528 = vsyncadd [#allocation6], 4294966016 }
  0x11   :  { %529 = dma.done.wait [#allocation9], 1024  }
  0x12   :  { %530 = vsyncadd [#allocation9], 4294966272  ;;  %v400_v0 = vld [vmem:[#allocation5 + $0x8] sm:$0xff]  ;;  %v399_v2 = vld [vmem:[#allocation5] sm:$0xff]  ;;  %vm116_vm0 = vcmask 261120   ;;  %v314_v41 = vstv %s625_s8  ;;  %vm317_vm4 = vcmask 7168  }
  0x13   :  { %v408_v1 = vld [vmem:[#allocation7 + $0x38] sm:$0xff]  ;;  %126 = vmatpush.bf16.msra.mxu0 %v400_v0  ;;  %v407_v3 = vld [vmem:[#allocation7 + $0x30] sm:$0xff]  ;;  %v95_v4 = vld [vmem:[#allocation3] sm:$0xf] }
  0x14   :  { %205 = vmatpush.bf16.msra.mxu1 %v408_v1  ;;  %v406_v5 = vld [vmem:[#allocation7 + $0x28] sm:$0xff]  ;;  %v405_v6 = vld [vmem:[#allocation7 + $0x20] sm:$0xff]  ;;  %v404_v7 = vld [vmem:[#allocation7 + $0x18] sm:$0xff] }
  0x15   :  { %v403_v8 = vld [vmem:[#allocation7 + $0x10] sm:$0xff]  ;;  %v402_v9 = vld [vmem:[#allocation7 + $0x8] sm:$0xff]  ;;  %v401_v10 = vld [vmem:[#allocation7] sm:$0xff] }
  0x16   :  { %v416_v11 = vld [vmem:[#allocation8 + $0x38] sm:$0xff]  ;;  %v415_v12 = vld [vmem:[#allocation8 + $0x30] sm:$0xff]  ;;  %v414_v13 = vld [vmem:[#allocation8 + $0x28] sm:$0xff] }
  0x17   :  { %127 = vmatpush.bf16.msra.mxu0 %v399_v2  ;;  %290 = vmatpush.bf16.msra.mxu2 %v416_v11  ;;  %v413_v14 = vld [vmem:[#allocation8 + $0x20] sm:$0xff]  ;;  %v412_v15 = vld [vmem:[#allocation8 + $0x18] sm:$0xff]  ;;  %v411_v16 = vld [vmem:[#allocation8 + $0x10] sm:$0xff] }
  0x18   :  { %206 = vmatpush.bf16.msra.mxu1 %v407_v3  ;;  %v423_v17 = vld [vmem:[%s619_s2] ss:$0 sm:$0xff]  ;;  %v409_v25 = vld [vmem:[#allocation8] sm:$0xff] }
  0x19   :  { %v410_v24 = vld [vmem:[#allocation8 + $0x8] sm:$0xff] }
  0x1a   :  { %334 = vmatmul.msk.bf16.vlgmr.msra.gmra.mxu0 %vm116_vm0, %v95_v4  ;;  %v424_v26 = vld [vmem:[%s621_s4] ss:$0 sm:$0xff] }
  0x1b   :  { %291 = vmatpush.bf16.msra.mxu2 %v415_v12  ;;  %v425_v33 = vld [vmem:[%s623_s6] ss:$0 sm:$0xff] }
  0x1c   :  { %207 = vmatpush.bf16.msra.mxu1 %v406_v5  ;;  %v426_v36 = vld [vmem:[%s624_s7] ss:$0 sm:$0xff] }
  0x1f   :  { %292 = vmatpush.bf16.msra.mxu2 %v414_v13 }
  0x20   :  { %208 = vmatpush.bf16.msra.mxu1 %v405_v6 }
  0x23   :  { %293 = vmatpush.bf16.msra.mxu2 %v413_v14 }
  0x24   :  { %209 = vmatpush.bf16.msra.mxu1 %v404_v7 }
  0x27   :  { %294 = vmatpush.bf16.msra.mxu2 %v412_v15 }
  0x28   :  { %210 = vmatpush.bf16.msra.mxu1 %v403_v8 }
  0x2b   :  { %295 = vmatpush.bf16.msra.mxu2 %v411_v16 }
  0x2c   :  { %211 = vmatpush.bf16.msra.mxu1 %v402_v9 }
  0x2f   :  { %296 = vmatpush.bf16.msra.mxu2 %v410_v24 }
  0x30   :  { %212 = vmatpush.bf16.msra.mxu1 %v401_v10 }
  0x33   :  { %297 = vmatpush.bf16.msra.mxu2 %v409_v25 }
  0x97   :  { %v129_v18 = vpop.f32.mrf.mxu0 }
  0x98   :  { %v130_v19 = vadd.f32 %v423_v17, %v129_v18 }
  0x9a   :  { %v134_v20 = vmul.f32 0.01, %v130_v19  ;;  %vm133_vm1 = vcmp.gt.f32.partialorder %v130_v19, 0.0 }
  0x9c   :  { %v135_v21 = vsel %vm133_vm1, %v130_v19, %v134_v20 }
  0x9d   :  { %v136_v22 = vpack.c.bf16 %v135_v21, %v135_v21 }
  0x9f   :  { %v131_v23 = vpop.f32.mrf.mxu0  ;;  %213 = vmatmul.bf16.vlgmr.msra.gmra.mxu1 %v136_v22 }
 0x11c   :  { %v214_v27 = vpop.f32.mrf.mxu1 }
 0x11d   :  { %v215_v28 = vadd.f32 %v424_v26, %v214_v27 }
 0x11f   :  { %v219_v29 = vmul.f32 0.01, %v215_v28  ;;  %vm218_vm2 = vcmp.gt.f32.partialorder %v215_v28, 0.0 }
 0x121   :  { %v220_v30 = vsel %vm218_vm2, %v215_v28, %v219_v29 }
 0x122   :  { %v221_v31 = vpack.c.bf16 %v220_v30, %v220_v30 }
 0x124   :  { %v216_v32 = vpop.f32.mrf.mxu1  ;;  %298 = vmatmul.bf16.vlgmr.msra.gmra.mxu2 %v221_v31 }
 0x1a7   :  { %v299_v34 = vpop.f32.mrf.mxu2 }
 0x1a8   :  { %v300_v35 = vadd.f32 %v425_v33, %v299_v34 }
 0x1aa   :  { %v304_v37 = vmul.f32 0.01, %v300_v35  ;;  %vm303_vm3 = vcmp.gt.f32.partialorder %v300_v35, 0.0 }
 0x1ac   :  { %v305_v38 = vsel %vm303_vm3, %v300_v35, %v304_v37 }
 0x1ad   :  { %v310_v39 = vmul.f32 %v426_v36, %v305_v38 }
 0x1af   :  { %v301_v40 = vpop.f32.mrf.mxu2  ;;  %311 = vadd.xlane.f32.xlu0 %v310_v39 }
 0x222   :  { %v312_v42 = vpop.xlane.xlu0 %311 }
 0x223   :  { %v315_v43 = vadd.f32 %v314_v41, %v312_v42 }
 0x225   :  { %427 = vtanh.f32 %v315_v43 }
 0x22b   :  { %v428_v44 = vpop.eup %427 }
 0x22c   :  { %318 = vst.msk [vmem:[%s626_s9] sm:$0xff] %vm317_vm4, %v428_v44 }
 0x22d   :  { %323 = vsyncpa [#allocation4], 1 }
 0x22e   :  { %324 = vsyncpa [#allocation6], 1 }
 0x22f   :  { %325 = vsyncpa [#allocation9], 1 }

</bundles_post_ra>
